<compile_context>
chip_gen: v5e
topology: v5e:2x2
jax: 0.10.0
libtpu: 0.0.40
codegen_flags: <defaults>
</compile_context>

<pallas_src>
import functools

import jax
import jax.numpy as jnp
from jax.experimental import pallas as pl
from jax.experimental.pallas import tpu as pltpu


_LANES = 128
_OUT_SUB = 8
_NP = 2                                  # parallel grid slices (v7x megacore); harmless on 1-TC chips
_VMEM_LIMIT = 32 * 1024 * 1024           # explicit scoped-VMEM limit (safe on v5e/v6e/v7x)
_INPUT_VMEM_BUDGET = 12 * 1024 * 1024    # budget for double-buffered input tiles


def _cdiv(a, b):
    return -(-a // b)


def _round_up(x, m):
    return _cdiv(x, m) * m


def _sublane_gran(dtype):
    # min second-to-last tile dim: 8 (f32), 16 (bf16), 32 (int8/fp8)
    return max(8, 32 // jnp.dtype(dtype).itemsize)


def _focal_weight(one_minus_p, gamma):
    """(1 - p)^gamma; small integer gamma -> repeated VPU multiplies (no pow)."""
    g_int = int(gamma)
    if float(gamma) == float(g_int) and 0 <= g_int <= 8:
        w = jnp.ones_like(one_minus_p)
        for _ in range(g_int):
            w = w * one_minus_p
        return w
    return jnp.power(one_minus_p, jnp.float32(gamma))


# ----------------------------------------------------------------------------
# Path A: lane-dense packed kernel for C == 2 (module default).
# ----------------------------------------------------------------------------
def _packed_c2_kernel(x_ref, lab_ref, alpha_ref, out_ref, *,
                      gamma, n_elems, tile_rows):
    p = pl.program_id(0)
    t = pl.program_id(1)
    tpc = pl.num_programs(1)

    x = x_ref[...].astype(jnp.float32)               # (TR, 128) packed logits
    lab = lab_ref[...]                               # (TR, 128) sample label per lane
    alpha_lane = alpha_ref[...].astype(jnp.float32)  # (1, 128)  alpha[class_of_lane]

    tr, nl = x.shape
    lane = jax.lax.broadcasted_iota(jnp.int32, (tr, nl), 1)
    lane_class = lane & 1                            # class index of this lane
    is_true = lane_class == lab                      # lane holds its sample's true-class logit

    # Partner logit via two lane rotations + select (pairs never straddle a row).
    nxt = pltpu.roll(x, shift=nl - 1, axis=1)        # lane l <- lane l+1
    prv = pltpu.roll(x, shift=1, axis=1)             # lane l <- lane l-1
    z_other = jnp.where(lane_class == 0, nxt, prv)

    # 2-class softmax of the "self" logit in stable log-sigmoid form.
    s = x - z_other                                  # z_true - z_other on true lanes
    e = jnp.exp(-jnp.abs(s))
    log1pe = jnp.log(1.0 + e)
    log_p = jnp.where(s < 0.0, s, 0.0) - log1pe      # log sigmoid(s)  = log P[true]
    log_1mp = jnp.where(s > 0.0, -s, 0.0) - log1pe   # log sigmoid(-s) = log(1 - P)
    one_minus_p = jnp.exp(log_1mp)

    weight = _focal_weight(one_minus_p, gamma)
    loss_lane = -alpha_lane * weight * log_p         # (TR, 128)

    # Keep only the true lane of each sample, and only real (non-padded) elements.
    row0 = (p * tpc + t) * tile_rows
    rows = row0 + jax.lax.broadcasted_iota(jnp.int32, (tr, nl), 0)
    flat = rows * nl + lane
    valid = is_true & (flat < n_elems)
    partial = jnp.sum(jnp.where(valid, loss_lane, 0.0))

    @pl.when(t == 0)
    def _():
        out_ref[...] = jnp.zeros_like(out_ref)

    out_ref[...] += partial


def _focal_loss_c2_packed(inputs, labels, alpha_vec, gamma, tile_rows):
    n, c = inputs.shape
    assert c == 2
    esz = jnp.dtype(inputs.dtype).itemsize
    gran = _sublane_gran(inputs.dtype)

    n_elems = n * 2
    data_rows = _cdiv(n_elems, _LANES)               # packed 128-lane rows of real data

    if tile_rows is None:
        bytes_per_row = 2 * _LANES * (esz + 4)       # dbl-buffered logits + int32 labels
        tile_rows = max(gran, _INPUT_VMEM_BUDGET // bytes_per_row)
    tr = _round_up(min(int(tile_rows), _round_up(data_rows, gran)), gran)

    tiles = _cdiv(data_rows, tr)
    tpc = _cdiv(tiles, _NP)
    total_rows = _NP * tpc * tr

    flat = inputs.reshape(-1)                        # contiguous reshape: no copy
    lab_rep = jnp.repeat(labels.astype(jnp.int32), 2)
    pad = total_rows * _LANES - n_elems
    if pad:
        flat = jnp.pad(flat, (0, pad))
        lab_rep = jnp.pad(lab_rep, (0, pad))
    x_packed = flat.reshape(total_rows, _LANES)
    lab_packed = lab_rep.reshape(total_rows, _LANES)
    alpha_tile = jnp.tile(alpha_vec.astype(jnp.float32), _LANES // 2).reshape(1, _LANES)

    kernel = functools.partial(_packed_c2_kernel, gamma=float(gamma),
                               n_elems=n_elems, tile_rows=tr)
    partials = pl.pallas_call(
        kernel,
        out_shape=jax.ShapeDtypeStruct((_NP * _OUT_SUB, _LANES), jnp.float32),
        grid_spec=pltpu.PrefetchScalarGridSpec(
            num_scalar_prefetch=0,
            grid=(_NP, tpc),
            in_specs=[
                pl.BlockSpec((tr, _LANES), lambda p, t: (p * tpc + t, 0)),
                pl.BlockSpec((tr, _LANES), lambda p, t: (p * tpc + t, 0)),
                pl.BlockSpec((1, _LANES), lambda p, t: (0, 0)),
            ],
            out_specs=pl.BlockSpec((_OUT_SUB, _LANES), lambda p, t: (p, 0)),
        ),
        compiler_params=pltpu.CompilerParams(
            dimension_semantics=("parallel", "arbitrary"),
            vmem_limit_bytes=_VMEM_LIMIT),
    )(x_packed, lab_packed, alpha_tile)

    return jnp.sum(partials[::_OUT_SUB, 0])          # one partial per parallel slice


# ----------------------------------------------------------------------------
# Path B: general-C kernel (classes on the lane axis).
# ----------------------------------------------------------------------------
def _general_kernel(x_ref, lab_ref, alpha_ref, out_ref, *,
                    gamma, n_rows, tile_rows):
    p = pl.program_id(0)
    t = pl.program_id(1)
    tpc = pl.num_programs(1)

    logits = x_ref[...].astype(jnp.float32)          # (TN, C)
    labels = lab_ref[...]                            # (TN, 1) int32
    alpha_row = alpha_ref[...].astype(jnp.float32)   # (1, C)

    tn, c = logits.shape
    class_ids = jax.lax.broadcasted_iota(jnp.int32, (tn, c), 1)
    is_true = class_ids == labels                    # fused one-hot (no f32 mask temp)

    # Log-softmax of the true class, log-sum-exp form (never log(0)).
    m = jnp.max(logits, axis=1, keepdims=True)
    denom = jnp.sum(jnp.exp(logits - m), axis=1, keepdims=True)
    z_true = jnp.sum(jnp.where(is_true, logits, 0.0), axis=1, keepdims=True)
    alpha_ = jnp.sum(jnp.where(is_true, alpha_row, 0.0), axis=1, keepdims=True)

    log_p = (z_true - m) - jnp.log(denom)
    one_minus_p = 1.0 - jnp.exp(log_p)
    weight = _focal_weight(one_minus_p, gamma)
    loss_rows = -alpha_ * weight * log_p             # (TN, 1)

    row0 = (p * tpc + t) * tile_rows
    rows = row0 + jax.lax.broadcasted_iota(jnp.int32, (tn, 1), 0)
    partial = jnp.sum(jnp.where(rows < n_rows, loss_rows, 0.0))

    @pl.when(t == 0)
    def _():
        out_ref[...] = jnp.zeros_like(out_ref)

    out_ref[...] += partial


def _focal_loss_general(inputs, labels, alpha_vec, gamma, tile_rows):
    n, c = inputs.shape
    esz = jnp.dtype(inputs.dtype).itemsize
    gran = _sublane_gran(inputs.dtype)

    c_pad = _round_up(c, _LANES)                     # VMEM lane padding of the logits tile
    if tile_rows is None:
        bytes_per_row = 2 * (c_pad * esz + _LANES * 4)
        tile_rows = max(gran, _INPUT_VMEM_BUDGET // bytes_per_row)
    tn = _round_up(min(int(tile_rows), _round_up(n, gran)), gran)

    tiles = _cdiv(n, tn)
    tpc = _cdiv(tiles, _NP)
    total_rows = _NP * tpc * tn

    x = inputs
    lab2d = labels.astype(jnp.int32).reshape(n, 1)
    pad = total_rows - n
    if pad:
        x = jnp.pad(x, ((0, pad), (0, 0)))
        lab2d = jnp.pad(lab2d, ((0, pad), (0, 0)))
    alpha_row = alpha_vec.astype(jnp.float32).reshape(1, c)

    kernel = functools.partial(_general_kernel, gamma=float(gamma),
                               n_rows=n, tile_rows=tn)
    partials = pl.pallas_call(
        kernel,
        out_shape=jax.ShapeDtypeStruct((_NP * _OUT_SUB, _LANES), jnp.float32),
        grid_spec=pltpu.PrefetchScalarGridSpec(
            num_scalar_prefetch=0,
            grid=(_NP, tpc),
            in_specs=[
                pl.BlockSpec((tn, c), lambda p, t: (p * tpc + t, 0)),
                pl.BlockSpec((tn, 1), lambda p, t: (p * tpc + t, 0)),
                pl.BlockSpec((1, c), lambda p, t: (0, 0)),
            ],
            out_specs=pl.BlockSpec((_OUT_SUB, _LANES), lambda p, t: (p, 0)),
        ),
        compiler_params=pltpu.CompilerParams(
            dimension_semantics=("parallel", "arbitrary"),
            vmem_limit_bytes=_VMEM_LIMIT),
    )(x, lab2d, alpha_row)

    return jnp.sum(partials[::_OUT_SUB, 0])


# ----------------------------------------------------------------------------
# Public wrapper + pure-JAX reference.
# ----------------------------------------------------------------------------
def focal_loss(inputs, labels, alpha_vec, *, gamma=2.0, size_average=True,
               tile_rows=None):
    """inputs: (N, C) logits (any float dtype); labels: (N,) int; alpha_vec: (C,)."""
    n, c = inputs.shape
    if c == 2:
        total = _focal_loss_c2_packed(inputs, labels, alpha_vec, gamma, tile_rows)
    else:
        total = _focal_loss_general(inputs, labels, alpha_vec, gamma, tile_rows)
    if size_average:
        total = total / jnp.float32(n)
    return total


def focal_loss_ref(inputs, labels, alpha_vec, *, gamma=2.0, size_average=True):
    """Pure-JAX reference mirroring the PyTorch forward."""
    n, c = inputs.shape
    p = jax.nn.softmax(inputs.astype(jnp.float32), axis=1)
    class_mask = jax.nn.one_hot(labels, c, dtype=jnp.float32)
    alpha_ = alpha_vec.astype(jnp.float32)[labels].reshape(n, 1)
    probs = jnp.sum(p * class_mask, axis=1, keepdims=True)
    log_p = jnp.log(probs)
    batch_loss = -alpha_ * jnp.power(1.0 - probs, gamma) * log_p
    return jnp.mean(batch_loss) if size_average else jnp.sum(batch_loss)


if __name__ == "__main__":
    key = jax.random.PRNGKey(0)
    k1, k2, k3, k4, k5, k6 = jax.random.split(key, 6)
    gamma = 2.0

    # --- Test 1: module defaults (class_num=2, alpha=0.25, gamma=2), f32, mean.
    n1, c1 = 8, 2
    alpha1 = jnp.full((c1,), 0.25, dtype=jnp.float32)
    x1 = jax.random.normal(k1, (n1, c1), dtype=jnp.float32)
    y1 = jax.random.randint(k2, (n1,), 0, c1, dtype=jnp.int32)
    got1 = jax.block_until_ready(
        focal_loss(x1, y1, alpha1, gamma=gamma, size_average=True))
    ref1 = focal_loss_ref(x1, y1, alpha1, gamma=gamma, size_average=True)
    assert jnp.allclose(got1, ref1, atol=1e-5, rtol=1e-5), (got1, ref1)

    # --- Test 2: bf16 logits, packed multi-tile grid + remainder masking, sum.
    n2, c2 = 3000, 2
    alpha2 = jnp.full((c2,), 0.25, dtype=jnp.float32)
    x2 = jax.random.normal(k3, (n2, c2), dtype=jnp.float32).astype(jnp.bfloat16)
    y2 = jax.random.randint(k4, (n2,), 0, c2, dtype=jnp.int32)
    got2 = jax.block_until_ready(
        focal_loss(x2, y2, alpha2, gamma=gamma, size_average=False, tile_rows=16))
    ref2 = focal_loss_ref(x2.astype(jnp.float32), y2, alpha2, gamma=gamma,
                          size_average=False)
    assert jnp.allclose(got2, ref2, atol=1e-2, rtol=1e-4), (got2, ref2)

    # --- Test 3: general-C path (C=10), multi-step accumulation + masking, mean.
    n3, c3 = 200, 10
    alpha3 = jnp.linspace(0.1, 1.0, c3, dtype=jnp.float32)
    x3 = jax.random.normal(k5, (n3, c3), dtype=jnp.float32)
    y3 = jax.random.randint(k6, (n3,), 0, c3, dtype=jnp.int32)
    got3 = jax.block_until_ready(
        focal_loss(x3, y3, alpha3, gamma=gamma, size_average=True, tile_rows=64))
    ref3 = focal_loss_ref(x3, y3, alpha3, gamma=gamma, size_average=True)
    assert jnp.allclose(got3, ref3, atol=1e-5, rtol=1e-5), (got3, ref3)

    print("KERNEL_OK")
</pallas_src>

<mosaic_0001>
module attributes {stable_mosaic.version = 11 : i64} {
  func.func @_packed_c2_kernel(%arg0: i32, %arg1: i32, %arg2: memref<8x128xf32, #tpu.memory_space<vmem>>, %arg3: memref<8x128xi32, #tpu.memory_space<vmem>>, %arg4: memref<1x128xf32, #tpu.memory_space<vmem>>, %arg5: memref<8x128xf32, #tpu.memory_space<vmem>>) attributes {dimension_semantics = [#tpu.dimension_semantics<parallel>, #tpu.dimension_semantics<arbitrary>], iteration_bounds = array<i64: 2, 1>, scalar_prefetch = 0 : i64, scratch_operands = 0 : i64, tpu.core_type = #tpu.core_type<tc>, window_params = [{transform_indices = @transform_0, window_bounds = array<i64: 8, 128>}, {transform_indices = @transform_1, window_bounds = array<i64: 8, 128>}, {pipeline_mode = #tpu.pipeline_mode<synchronous>, transform_indices = @transform_2, window_bounds = array<i64: 1, 128>}, {transform_indices = @transform_3, window_bounds = array<i64: 8, 128>}]} {
    %c0 = arith.constant 0 : index
    %c0_0 = arith.constant 0 : index
    %0 = vector.load %arg2[%c0, %c0_0] : memref<8x128xf32, #tpu.memory_space<vmem>>, vector<8x128xf32>
    %c0_1 = arith.constant 0 : index
    %c0_2 = arith.constant 0 : index
    %1 = vector.load %arg3[%c0_1, %c0_2] : memref<8x128xi32, #tpu.memory_space<vmem>>, vector<8x128xi32>
    %c0_3 = arith.constant 0 : index
    %c0_4 = arith.constant 0 : index
    %2 = vector.load %arg4[%c0_3, %c0_4] : memref<1x128xf32, #tpu.memory_space<vmem>>, vector<1x128xf32>
    %3 = tpu.iota {dimensions = array<i32: 1>} : vector<8x128xi32>
    %c1_i32 = arith.constant 1 : i32
    %4 = vector.broadcast %c1_i32 : i32 to vector<8x128xi32>
    %5 = arith.andi %3, %4 : vector<8x128xi32>
    %6 = arith.cmpi eq, %5, %1 : vector<8x128xi32>
    %c127_i32 = arith.constant 127 : i32
    %7 = tpu.dynamic_rotate %0 by %c127_i32 dim 1 : vector<8x128xf32>, i32 -> vector<8x128xf32>
    %c1_i32_5 = arith.constant 1 : i32
    %8 = tpu.dynamic_rotate %0 by %c1_i32_5 dim 1 : vector<8x128xf32>, i32 -> vector<8x128xf32>
    %c0_i32 = arith.constant 0 : i32
    %9 = vector.broadcast %c0_i32 : i32 to vector<8x128xi32>
    %10 = arith.cmpi eq, %5, %9 : vector<8x128xi32>
    %11 = arith.select %10, %7, %8 : vector<8x128xi1>, vector<8x128xf32>
    %12 = arith.subf %0, %11 : vector<8x128xf32>
    %13 = math.absf %12 : vector<8x128xf32>
    %cst = arith.constant 0.000000e+00 : f32
    %14 = vector.broadcast %cst : f32 to vector<8x128xf32>
    %15 = arith.subf %14, %13 : vector<8x128xf32>
    %16 = math.exp %15 : vector<8x128xf32>
    %cst_6 = arith.constant 1.000000e+00 : f32
    %17 = vector.broadcast %cst_6 : f32 to vector<8x128xf32>
    %18 = arith.addf %17, %16 : vector<8x128xf32>
    %19 = math.log %18 : vector<8x128xf32>
    %cst_7 = arith.constant 0.000000e+00 : f32
    %20 = vector.broadcast %cst_7 : f32 to vector<8x128xf32>
    %21 = arith.cmpf olt, %12, %20 : vector<8x128xf32>
    %cst_8 = arith.constant 0.000000e+00 : f32
    %22 = vector.broadcast %cst_8 : f32 to vector<8x128xf32>
    %23 = arith.select %21, %12, %22 : vector<8x128xi1>, vector<8x128xf32>
    %24 = arith.subf %23, %19 : vector<8x128xf32>
    %cst_9 = arith.constant 0.000000e+00 : f32
    %25 = vector.broadcast %cst_9 : f32 to vector<8x128xf32>
    %26 = arith.cmpf ogt, %12, %25 : vector<8x128xf32>
    %cst_10 = arith.constant 0.000000e+00 : f32
    %27 = vector.broadcast %cst_10 : f32 to vector<8x128xf32>
    %28 = arith.subf %27, %12 : vector<8x128xf32>
    %cst_11 = arith.constant 0.000000e+00 : f32
    %29 = vector.broadcast %cst_11 : f32 to vector<8x128xf32>
    %30 = arith.select %26, %28, %29 : vector<8x128xi1>, vector<8x128xf32>
    %31 = arith.subf %30, %19 : vector<8x128xf32>
    %32 = math.exp %31 : vector<8x128xf32>
    %cst_12 = arith.constant 1.000000e+00 : f32
    %33 = vector.broadcast %cst_12 : f32 to vector<8x128xf32>
    %34 = arith.mulf %33, %32 : vector<8x128xf32>
    %35 = arith.mulf %34, %32 : vector<8x128xf32>
    %cst_13 = arith.constant 0.000000e+00 : f32
    %36 = vector.broadcast %cst_13 : f32 to vector<1x128xf32>
    %37 = arith.subf %36, %2 : vector<1x128xf32>
    %38 = vector.broadcast %37 : vector<1x128xf32> to vector<8x128xf32>
    %39 = arith.mulf %38, %35 : vector<8x128xf32>
    %40 = arith.mulf %39, %24 : vector<8x128xf32>
    %c1_i32_14 = arith.constant 1 : i32
    %41 = arith.muli %arg0, %c1_i32_14 : i32
    %42 = arith.addi %41, %arg1 : i32
    %c8_i32 = arith.constant 8 : i32
    %43 = arith.muli %42, %c8_i32 : i32
    %44 = tpu.iota {dimensions = array<i32: 0>} : vector<8x128xi32>
    %45 = vector.broadcast %43 : i32 to vector<8x128xi32>
    %46 = arith.addi %45, %44 : vector<8x128xi32>
    %c128_i32 = arith.constant 128 : i32
    %47 = vector.broadcast %c128_i32 : i32 to vector<8x128xi32>
    %48 = arith.muli %46, %47 : vector<8x128xi32>
    %49 = arith.addi %48, %3 : vector<8x128xi32>
    %c16_i32 = arith.constant 16 : i32
    %50 = vector.broadcast %c16_i32 : i32 to vector<8x128xi32>
    %51 = arith.cmpi slt, %49, %50 : vector<8x128xi32>
    %52 = arith.andi %6, %51 : vector<8x128xi1>
    %cst_15 = arith.constant 0.000000e+00 : f32
    %53 = vector.broadcast %cst_15 : f32 to vector<8x128xf32>
    %54 = arith.select %52, %40, %53 : vector<8x128xi1>, vector<8x128xf32>
    %55 = vector.shape_cast %54 : vector<8x128xf32> to vector<1x8x128xf32>
    %cst_16 = arith.constant dense<0.000000e+00> : vector<1xf32>
    %56 = vector.multi_reduction <add>, %55, %cst_16 [1, 2] : vector<1x8x128xf32> to vector<1xf32>
    %57 = vector.shape_cast %56 : vector<1xf32> to vector<1x1x1xf32>
    %58 = vector.extract %57[0, 0, 0] : f32 from vector<1x1x1xf32>
    %c0_i32_17 = arith.constant 0 : i32
    %59 = arith.cmpi eq, %arg1, %c0_i32_17 : i32
    %60 = arith.extui %59 : i1 to i32
    %c0_i32_18 = arith.constant 0 : i32
    %61 = arith.cmpi ne, %60, %c0_i32_18 : i32
    scf.if %61 {
      %cst_23 = arith.constant 0.000000e+00 : f32
      %66 = vector.broadcast %cst_23 : f32 to vector<8x128xf32>
      %c0_24 = arith.constant 0 : index
      %c0_25 = arith.constant 0 : index
      %67 = vector.load %arg5[%c0_24, %c0_25] : memref<8x128xf32, #tpu.memory_space<vmem>>, vector<8x128xf32>
      tpu.vector_store %arg5[%c0_24, %c0_25], %66 {strides = array<i32>} : memref<8x128xf32, #tpu.memory_space<vmem>>, vector<8x128xf32>,
    } else {
    }
    %c0_19 = arith.constant 0 : index
    %c0_20 = arith.constant 0 : index
    %62 = vector.load %arg5[%c0_19, %c0_20] : memref<8x128xf32, #tpu.memory_space<vmem>>, vector<8x128xf32>
    %63 = vector.broadcast %58 : f32 to vector<8x128xf32>
    %64 = arith.addf %62, %63 : vector<8x128xf32>
    %c0_21 = arith.constant 0 : index
    %c0_22 = arith.constant 0 : index
    %65 = vector.load %arg5[%c0_21, %c0_22] : memref<8x128xf32, #tpu.memory_space<vmem>>, vector<8x128xf32>
    tpu.vector_store %arg5[%c0_21, %c0_22], %64 {strides = array<i32>} : memref<8x128xf32, #tpu.memory_space<vmem>>, vector<8x128xf32>,
    return
  }
  func.func @transform_0(%arg0: i32, %arg1: i32) -> (i32, i32) {
    %c1_i32 = arith.constant 1 : i32
    %0 = arith.muli %arg0, %c1_i32 : i32
    %1 = arith.addi %0, %arg1 : i32
    %c0_i32 = arith.constant 0 : i32
    %c0_i32_0 = arith.constant 0 : i32
    return %1, %c0_i32 : i32, i32
  }
  func.func @transform_1(%arg0: i32, %arg1: i32) -> (i32, i32) {
    %c1_i32 = arith.constant 1 : i32
    %0 = arith.muli %arg0, %c1_i32 : i32
    %1 = arith.addi %0, %arg1 : i32
    %c0_i32 = arith.constant 0 : i32
    %c0_i32_0 = arith.constant 0 : i32
    return %1, %c0_i32 : i32, i32
  }
  func.func @transform_2(%arg0: i32, %arg1: i32) -> (i32, i32) {
    %c0_i32 = arith.constant 0 : i32
    %c0_i32_0 = arith.constant 0 : i32
    %c0_i32_1 = arith.constant 0 : i32
    return %c0_i32, %c0_i32_0 : i32, i32
  }
  func.func @transform_3(%arg0: i32, %arg1: i32) -> (i32, i32) {
    %c0_i32 = arith.constant 0 : i32
    %c0_i32_0 = arith.constant 0 : i32
    return %arg0, %c0_i32 : i32, i32
  }
}

</mosaic_0001>

<bundles_post_ra>
// kernel: tpu_custom_call.1
= control target key start
LH: loop header
LB: loop body
LE: loop exit
PB: predicated region body
PF: predicated region fallthrough
CT: control target
= control target key end

     0   :  { %8 = vsyncpa [#allocation3], 0  ;;  %s839_s0 = inlined_call_operand.hbm [shape: f32[16,128], index: 0, kind: input, shape index: {}]   ;;  %s840_s1 = inlined_call_operand.hbm [shape: s32[16,128], index: 1, kind: input, shape index: {}]   ;;  %s841_s2 = inlined_call_operand.vmem [shape: f32[1,128], index: 2, kind: input, shape index: {}]   ;;  %s842_s3 = inlined_call_operand.hbm [shape: f32[16,128], index: 3, kind: output, shape index: {}]  }
   0x1   :  { %10 = vsyncpa [#allocation3 + $0x1], 0 }
   0x2   :  { %11 = vsyncpa [#allocation6], 0 }
   0x3   :  { %13 = vsyncpa [#allocation6 + $0x1], 0 }
   0x4   :  { %14 = vsyncpa [#allocation4], 0 }
   0x5   :  { %16 = vsyncpa [#allocation4 + $0x1], 0  ;;  %s697_s12 = smov 0   ;;  %s699_s13 = smov 0  }
   0x6   :  { %s701_s14 = smov 0   ;;  %s703_s15 = smov 0  }
   0x7   :  { %s705_s16 = smov 0   ;;  %s707_s17 = smov 0  }
   0x8 LB: > { %s432_s18 = sadd.s32 4294967295, %s673_s17   ;;  %s433_s19 = sadd.s32 4294967294, %s673_s17   ;;  %s673_s17 = sphi %s707_s17, %s22_s17   ;;  %s669_s16 = sphi %s705_s16, %s851_s16   ;;  %s665_s15 = sphi %s703_s15, %s850_s15   ;;  %s661_s14 = sphi %s701_s14, %s849_s14   ;;  %s657_s13 = sphi %s699_s13, %s848_s13   ;;  %s653_s12 = sphi %s697_s12, %s847_s12  }
   0x9   : > { %s34_s20 = sadd.s32 1, %s669_s16  ;;  %s43_s21 = sadd.s32 1, %s661_s14 }
   0xa   : > { %p36_p0 = scmp.ge.s32.totalorder %s34_s20, 2  ;;  %p50_p1 = scmp.ne.s32.totalorder %s661_s14, %s657_s13 }
   0xb   : > { %p51_p2 = scmp.eq.s32.totalorder %s673_s17, 0  ;;  %p56_p3 = scmp.ne.s32.totalorder %s657_s13, %s653_s12 }
   0xc   : > { %s853_s20 = smov (%p36_p0, %s34_s20), 0  ;;  %p57_p5 = scmp.eq.s32.totalorder %s432_s18, 0 }
   0xd   : > { %p738_p4 = por %p51_p2, %p50_p1  ;;  %s40_s23 = ssub.s32 %s669_s16, %s853_s20 }
   0xe   : > { %p129_p6 = scmp.eq.s32.totalorder %s432_s18, 1  ;;  %p41_p7 = scmp.eq.s32.totalorder %s40_s23, 0 }
   0xf   : > { %p744_p8 = por %p57_p5, %p56_p3  ;;  %p135_p10 = scmp.eq.s32.totalorder %s433_s19, 1 }
  0x10   : > { %p748_p9 = por %p129_p6, %p50_p1  ;;  %p435_p12 = scmp.ge.s32.totalorder %s673_s17, 2 }
  0x11   : > { %s753_s26 = scalar_select %p41_p7, %s661_s14, %s43_s21  }
  0x12   : > { %p755_p11 = por %p135_p10, %p56_p3  ;;  %p468_p13 = scmp.lt.s32.totalorder %s673_s17, 2 }
  0x13   : > { %s158_s28 = sand.u32 1, %s661_s14   ;;  %s437_s30 = sshll.u32 %s669_s16, 3 }
  0x14   : > { %s436_s29 = sshll.u32 %s158_s28, 3  ;;  %s167_s6 = scalar_lea.hbm %s839_s0, %s437_s30 }
  0x15   : > { %s162_s7 = scalar_lea.vmem [#allocation2], %s436_s29  ;;  %s169_s9 = sshll.u32 %s167_s6, 4  ;;  %s170_s9 = int_to_ptr.hbm [resolvable:$true] %s169_s9 }
  0x16   : > { %s171_s8 = sshll.u32 %s162_s7, 4  ;;  %p458_p0 = pnand %p468_p13, %p738_p4  ;;  %s172_s8 = int_to_ptr.vmem [resolvable:$true] %s171_s8 }
  0x17   : > { %p440_p1 = scmp.ge.s32.totalorder %s673_s17, 1  ;;  %p196_p2 = scmp.lt.s32.totalorder %s673_s17, 3 }
  0x18   : > { %s159_s10 = scalar_lea.sflag [#allocation3], %s158_s28  ;;  %s187_s19 = scalar_lea.hbm %s840_s1, %s437_s30 }
  0x19   : > { %460 = dma.hbm_to_vmem [thread:$0]  (!%p458_p0), %s170_s9, 128, %s172_s8, %s159_s10  }
  0x1a   : > { %p197_p3 = pnand %p440_p1, %p196_p2  ;;  %s182_s21 = scalar_lea.vmem [#allocation5], %s436_s29 }
  0x1b   : > { %s191_s23 = sshll.u32 %s182_s21, 4  ;;  %s189_s4 = sshll.u32 %s187_s19, 4  ;;  %s192_s23 = int_to_ptr.vmem [resolvable:$true] %s191_s23  ;;  %s190_s4 = int_to_ptr.hbm [resolvable:$true] %s189_s4 }
  0x1c   : > { %s179_s5 = scalar_lea.sflag [#allocation6], %s158_s28  ;;  %200 = sbr.rel (%p197_p3) target bundleno = 387 (0x183), region = 32 }
  0x1d   : > { %463 = dma.hbm_to_vmem [thread:$0]  (!%p458_p0), %s190_s4, 128, %s192_s23, %s179_s5  }
  0x1e   : > { %s774_s22 = sand.u32 (!%p197_p3), 1, %s657_s13  }
  0x1f   : > { %s777_s6 = sshll.u32 (!%p197_p3), %s774_s22, 3  ;;  %s203_s7 = scalar_lea.sflag (!%p197_p3), [#allocation3], %s774_s22 }
  0x20   : > { %s206_s8 = scalar_lea.vmem (!%p197_p3), [#allocation2], %s777_s6 }
  0x21   : > { %640 = dma.done.wait (%p744_p8), %s203_s7, 128  }
  0x22   : > { %642 = vsyncadd (%p744_p8), %s203_s7, 4294967168  ;;  %s213_s28 = scalar_lea.sflag [#allocation6], %s774_s22  ;;  %s216_s29 = scalar_lea.vmem [#allocation5], %s777_s6 }
  0x23   : > { %644 = dma.done.wait (%p744_p8), %s213_s28, 128  }
  0x24   : > { %646 = vsyncadd (%p744_p8), %s213_s28, 4294967168  ;;  %v247_v0 = vld [vmem:[%s206_s8] sm:$0xff]  ;;  %s675_s30 = smov 127   ;;  %s676_s9 = smov 1   ;;  %v250_v1 = vlaneseq  ;;  %v248_v26 = vld [vmem:[%s216_s29] sm:$0xff] }
  0x25   : > { %254 = vrot.lane.b32.xlu0 %v247_v0, %s675_s30  ;;  %s444_s24 = sshll.u32 %s665_s15, 3  ;;  %v249_v21 = vld [vmem:[%s841_s2] sm:$0x1]  ;;  %s244_s23 = scalar_lea.vmem [#allocation7], %s777_s6 }
  0x26   : > { %v251_v2 = vand.u32 127, %v250_v1  ;;  %v287_v14 = vshrl.u32 %v250_v1, 7  ;;  %v288_v15 = vstv %s444_s24  ;;  %v278_v24 = vsub.f32 0.0, %v249_v21  ;;  %s324_s21 = scalar_lea.hbm %s842_s3, %s444_s24  ;;  %s326_s4 = sshll.u32 %s244_s23, 4  ;;  %s327_s4 = int_to_ptr.vmem [resolvable:$true] %s326_s4 }
  0x27   : > { %s328_s5 = sshll.u32 %s324_s21, 4  ;;  %s314_s8 = scalar_lea.sflag [#allocation4], %s774_s22  ;;  %s329_s5 = int_to_ptr.hbm [resolvable:$true] %s328_s5 }
  0x28   : > { %v252_v4 = vand.u32 1, %v251_v2  ;;  %v289_v19 = vadd.s32 %v288_v15, %v287_v14  ;;  %v280_v27 = vperm.slane %v278_v24, 0  ;;  %s601_s28 = sshra.s32 %s329_s5, 4  ;;  %s602_s28 = int_to_ptr.hbm [resolvable:$true] %s601_s28 }
  0x29   : > { %s603_s29 = scalar_lea.hbm %s602_s28, 8  ;;  %p608_p7 = scmp.lt.s32.totalorder %s602_s28, %s842_s3 }
  0x2a   : > { %vm258_vm0 = vcmp.eq.s32.totalorder %v252_v4, 0  ;;  %v290_v23 = vmul.u32 128, %v289_v19  ;;  %vm253_vm3 = vcmp.eq.s32.totalorder %v252_v4, %v248_v26  ;;  %p604_p4 = scmp.ne.s32.totalorder %s602_s28, %s603_s29 }
  0x2c   : > { %v291_v25 = vadd.s32 %v290_v23, %v251_v2  ;;  %p605_p5 = pnand %p604_p4, %p748_p9 }
  0x2d   : > { %256 = vrot.lane.b32.xlu0 %v247_v0, %s676_s9  ;;  %s607_s9 = scalar_lea.hbm %s842_s3, 16 }
  0x2e   : > { %vm292_vm4 = vcmp.lt.s32.totalorder %v291_v25, 16  ;;  %p606_p6 = pneg %p605_p5  ;;  %p609_p8 = scmp.lt.s32.totalorder %s607_s9, %s603_s29 }
  0x2f   : > { %vm293_vm5 = vmand %vm253_vm3, %vm292_vm4 }
  0x30   : > { %p610_p10 = por %p609_p8, %p608_p7 }
  0x32   : > { %p611_p13 = pnand %p610_p10, %p606_p6 }
  0x97   : > { %v255_v3 = vpop.permute.xlu0 %254 }
  0x9f   : > { %v257_v5 = vpop.permute.xlu0 %256 }
  0xa0   : > { %v259_v6 = vsel %vm258_vm0, %v255_v3, %v257_v5 }
  0xa1   : > { %v260_v7 = vsub.f32 %v247_v0, %v259_v6 }
  0xa3   : > { %v261_v8 = vand.u32 2147483647, %v260_v7  ;;  %v272_v13 = vsub.f32 0.0, %v260_v7  ;;  %vm271_vm1 = vcmp.gt.f32.partialorder %v260_v7, 0.0  ;;  %vm268_vm2 = vcmp.lt.f32.partialorder %v260_v7, 0.0 }
  0xa4   : > { %v269_v30 = vsel %vm268_vm2, %v260_v7, 0.0 }
  0xa5   : > { %v262_v9 = vsub.f32 0.0, %v261_v8  ;;  %v273_v18 = vsel %vm271_vm1, %v272_v13, 0.0 }
  0xa7   : > { %v263_v10 = vmul.f32 1.442695, %v262_v9 }
  0xa9   : > { %521 = vpow2.f32 %v263_v10 }
  0xaf   : > { %v522_v11 = vpop.eup %521 }
  0xb0   : > { %v265_v12 = vadd.f32 1.0, %v522_v11 }
  0xb2   : > { %523 = vlog2.f32 %v265_v12 }
  0xb8   : > { %v524_v16 = vpop.eup %523 }
  0xb9   : > { %v267_v17 = vmul.f32 0.6931472, %v524_v16 }
  0xbb   : > { %v274_v20 = vsub.f32 %v273_v18, %v267_v17  ;;  %v270_v31 = vsub.f32 %v269_v30, %v267_v17 }
  0xbd   : > { %v275_v22 = vmul.f32 1.442695, %v274_v20 }
  0xbf   : > { %525 = vpow2.f32 %v275_v22 }
  0xc5   : > { %v526_v28 = vpop.eup %525 }
  0xc6   : > { %v277_v29 = vmul.f32 %v526_v28, %v526_v28 }
  0xc8   : > { %v282_v32 = vmul.f32 %v280_v27, %v277_v29 }
  0xca   : > { %v283_v33 = vmul.f32 %v282_v32, %v270_v31 }
  0xcc   : > { %v294_v34 = vsel %vm293_vm5, %v283_v33, 0.0 }
  0xcd   : > { %295 = vadd.xlane.f32.xlu1 %v294_v34 }
 0x140   : > { %v296_v35 = vpop.xlane.xlu1 %295 }
 0x141   : > { %v297_v36 = vrot.slane %v296_v35, 4 }
 0x143   : > { %v298_v37 = vadd.f32 %v297_v36, %v296_v35 }
 0x145   : > { %v299_v38 = vrot.slane %v298_v37, 2 }
 0x147   : > { %v300_v39 = vadd.f32 %v299_v38, %v298_v37 }
 0x149   : > { %v301_v40 = vrot.slane %v300_v39, 1 }
 0x14b   : > { %v302_v41 = vadd.f32 %v301_v40, %v300_v39 }
 0x14d   : > { %449 = vpush %v302_v41 }
 0x17e   : > { %s450_s7 = spop %449 }
 0x17f   : > { %v310_v42 = vstv %s450_s7 }
 0x180   : > { %312 = vst [vmem:[%s244_s23] sm:$0xff] %v310_v42 }
 0x181   : > { %614 = shalt.err (!%p611_p13)
}
 0x182   : > { %455 = dma.vmem_to_hbm [thread:$0]  (%p748_p9), %s327_s4, 128, %s329_s5, %s314_s8  }
 0x183 PF: > { %s340_s22 = sand.u32 1, %s653_s12   ;;  %p465_p0 = pnand %p435_p12, %p755_p11 }
 0x184   : > { %s341_s10 = scalar_lea.sflag [#allocation4], %s340_s22 }
 0x185   : > { %p466_p1 = pneg %p465_p0 }
 0x187   : > { %648 = dma.done.wait (%p466_p1), %s341_s10, 128  }
 0x188   : > { %650 = vsyncadd (%p466_p1), %s341_s10, 4294967168  ;;  %s22_s17 = sadd.s32 1, %s673_s17   ;;  %s847_s12 = smov %s657_s13 }
 0x189   : > { %p19_p2 = scmp.ge.s32.totalorder %s22_s17, 4   ;;  %s848_s13 = smov %s661_s14 }
 0x18a   : > { %s849_s14 = smov %s753_s26  ;;  %s850_s15 = smov %s669_s16 }
 0x18b   : > { %s851_s16 = smov %s853_s20  ;;  %21 = sbr.rel (!%p19_p2) target bundleno = 8 (0x8), region = 94 }
 0x190   :  { %347 = vsyncpa [#allocation3], 1 }
 0x191   :  { %349 = vsyncpa [#allocation3 + $0x1], 1 }
 0x192   :  { %350 = vsyncpa [#allocation6], 1 }
 0x193   :  { %352 = vsyncpa [#allocation6 + $0x1], 1 }
 0x194   :  { %353 = vsyncpa [#allocation4], 1 }
 0x195   :  { %355 = vsyncpa [#allocation4 + $0x1], 1 }

</bundles_post_ra>
